<compile_context>
chip_gen: v5e
topology: v5e:2x2
jax: 0.10.0
libtpu: 0.0.40
codegen_flags: <defaults>
</compile_context>

<pallas_src>
import jax
import jax.numpy as jnp
from jax.experimental import pallas as pl
from jax.experimental.pallas import tpu as pltpu

LANE = 128


def dqn_kernel(x_ref, w1_ref, b1_ref, w2_ref, b2_ref, w3_ref, b3_ref,
               w4_ref, b4_ref, o_ref):
    # Layer 1: Linear + ReLU  (bf16 MXU matmul, f32 accumulate, f32 elementwise)
    h = jnp.dot(x_ref[...], w1_ref[...], preferred_element_type=jnp.float32)
    h = jnp.maximum(h + b1_ref[...], 0.0)
    # Layer 2: Linear + ReLU
    h = jnp.dot(h.astype(w2_ref.dtype), w2_ref[...],
                preferred_element_type=jnp.float32)
    h = jnp.maximum(h + b2_ref[...], 0.0)
    # Layer 3: Linear + ReLU
    h = jnp.dot(h.astype(w3_ref.dtype), w3_ref[...],
                preferred_element_type=jnp.float32)
    h = jnp.maximum(h + b3_ref[...], 0.0)
    # Output layer: Linear (no activation), lane-padded to a dense 128-wide store.
    o = jnp.dot(h.astype(w4_ref.dtype), w4_ref[...],
                preferred_element_type=jnp.float32)
    o_ref[...] = (o + b4_ref[...]).astype(o_ref.dtype)


def dqn_forward(x, params, *, tb=1024, matmul_dtype=jnp.bfloat16):
    """x: (B, input_size) float32. params: (in,out) weights + (1,out) biases."""
    B, in_size = x.shape
    hidden = params["w1"].shape[1]
    out_size = params["w4"].shape[1]

    # --- Lane-dense output: pad final layer columns up to a multiple of 128 ---
    out_pad = max(LANE, pl.cdiv(out_size, LANE) * LANE)
    w4 = jnp.pad(params["w4"], ((0, 0), (0, out_pad - out_size)))
    b4 = jnp.pad(params["b4"], ((0, 0), (0, out_pad - out_size)))

    # --- Large batch tile; pad B so the grid divides evenly (tail = zeros) ---
    tb_eff = int(min(tb, max(8, pl.cdiv(B, 8) * 8)))
    tb_eff = max(8, (tb_eff // 8) * 8)
    B_pad = pl.cdiv(B, tb_eff) * tb_eff
    x_p = jnp.pad(x, ((0, B_pad - B), (0, 0))) if B_pad != B else x

    # --- bf16 matmul operands, f32 biases (accumulation stays f32 in-kernel) ---
    x_p = x_p.astype(matmul_dtype)
    w1 = params["w1"].astype(matmul_dtype)
    w2 = params["w2"].astype(matmul_dtype)
    w3 = params["w3"].astype(matmul_dtype)
    w4 = w4.astype(matmul_dtype)
    b1 = params["b1"].astype(jnp.float32)
    b2 = params["b2"].astype(jnp.float32)
    b3 = params["b3"].astype(jnp.float32)
    b4 = b4.astype(jnp.float32)

    def full(shape):
        return pl.BlockSpec(shape, lambda i: tuple(0 for _ in shape))

    grid_spec = pltpu.PrefetchScalarGridSpec(
        num_scalar_prefetch=0,
        grid=(B_pad // tb_eff,),
        in_specs=[
            pl.BlockSpec((tb_eff, in_size), lambda i: (i, 0)),   # x tile
            full((in_size, hidden)), full((1, hidden)),          # layer 1
            full((hidden, hidden)), full((1, hidden)),           # layer 2
            full((hidden, hidden)), full((1, hidden)),           # layer 3
            full((hidden, out_pad)), full((1, out_pad)),         # layer 4 (padded)
        ],
        out_specs=pl.BlockSpec((tb_eff, out_pad), lambda i: (i, 0)),
    )

    out = pl.pallas_call(
        dqn_kernel,
        out_shape=jax.ShapeDtypeStruct((B_pad, out_pad), jnp.float32),
        grid_spec=grid_spec,
        compiler_params=pltpu.CompilerParams(
            dimension_semantics=("parallel",)),
    )(x_p, w1, b1, w2, b2, w3, b3, w4, b4)

    return out[:B, :out_size]


def init_params(key, input_size, hidden_size, output_size):
    """Deterministic synthetic init. PyTorch Linear weights are (out, in);
    we generate in that convention then transpose to (in, out) for the kernel."""
    dims = [(hidden_size, input_size), (hidden_size, hidden_size),
            (hidden_size, hidden_size), (output_size, hidden_size)]
    params = {}
    keys = jax.random.split(key, 2 * len(dims))
    for li, (out_d, in_d) in enumerate(dims, start=1):
        bound = 1.0 / jnp.sqrt(in_d)
        w_pt = jax.random.uniform(keys[2 * (li - 1)], (out_d, in_d),
                                  jnp.float32, -bound, bound)
        b_pt = jax.random.uniform(keys[2 * (li - 1) + 1], (out_d,),
                                  jnp.float32, -bound, bound)
        params[f"w{li}"] = w_pt.T                    # (in, out)
        params[f"b{li}"] = b_pt.reshape(1, out_d)    # (1, out)
    return params


def dqn_reference(x, params, matmul_dtype=jnp.bfloat16):
    """Pure-JAX reference mirroring the kernel's bf16-matmul / f32-accumulate path."""
    def layer(h, w, b, relu):
        y = jnp.dot(h.astype(matmul_dtype), w.astype(matmul_dtype),
                    preferred_element_type=jnp.float32) + b.astype(jnp.float32)
        return jnp.maximum(y, 0.0) if relu else y
    h = layer(x, params["w1"], params["b1"], True)
    h = layer(h, params["w2"], params["b2"], True)
    h = layer(h, params["w3"], params["b3"], True)
    return layer(h, params["w4"], params["b4"], False)


if __name__ == "__main__":
    input_size, hidden_size, output_size = 16, 32, 4
    batch = 8

    key = jax.random.PRNGKey(0)
    k_params, k_x, k_x2 = jax.random.split(key, 3)
    params = init_params(k_params, input_size, hidden_size, output_size)

    # Small primary check (single grid step).
    x = jax.random.normal(k_x, (batch, input_size), jnp.float32)
    out = jax.block_until_ready(dqn_forward(x, params))
    ref = dqn_reference(x, params)
    assert out.shape == (batch, output_size)
    assert jnp.allclose(out, ref, atol=1e-3, rtol=1e-3)

    # Secondary check: batch not a multiple of 8 exercises the padding path.
    x2 = jax.random.normal(k_x2, (300, input_size), jnp.float32)
    out2 = jax.block_until_ready(dqn_forward(x2, params))
    ref2 = dqn_reference(x2, params)
    assert out2.shape == (300, output_size)
    assert jnp.allclose(out2, ref2, atol=1e-3, rtol=1e-3)

    print("KERNEL_OK")
</pallas_src>

<mosaic_0001>
module attributes {stable_mosaic.version = 11 : i64} {
  func.func @dqn_kernel(%arg0: i32, %arg1: memref<8x16xbf16, #tpu.memory_space<vmem>>, %arg2: memref<16x32xbf16, #tpu.memory_space<vmem>>, %arg3: memref<1x32xf32, #tpu.memory_space<vmem>>, %arg4: memref<32x32xbf16, #tpu.memory_space<vmem>>, %arg5: memref<1x32xf32, #tpu.memory_space<vmem>>, %arg6: memref<32x32xbf16, #tpu.memory_space<vmem>>, %arg7: memref<1x32xf32, #tpu.memory_space<vmem>>, %arg8: memref<32x128xbf16, #tpu.memory_space<vmem>>, %arg9: memref<1x128xf32, #tpu.memory_space<vmem>>, %arg10: memref<8x128xf32, #tpu.memory_space<vmem>>) attributes {dimension_semantics = [#tpu.dimension_semantics<parallel>], iteration_bounds = array<i64: 1>, scalar_prefetch = 0 : i64, scratch_operands = 0 : i64, tpu.core_type = #tpu.core_type<tc>, window_params = [{transform_indices = @transform_0, window_bounds = array<i64: 8, 16>}, {pipeline_mode = #tpu.pipeline_mode<synchronous>, transform_indices = @transform_1, window_bounds = array<i64: 16, 32>}, {pipeline_mode = #tpu.pipeline_mode<synchronous>, transform_indices = @transform_2, window_bounds = array<i64: 1, 32>}, {pipeline_mode = #tpu.pipeline_mode<synchronous>, transform_indices = @transform_3, window_bounds = array<i64: 32, 32>}, {pipeline_mode = #tpu.pipeline_mode<synchronous>, transform_indices = @transform_4, window_bounds = array<i64: 1, 32>}, {pipeline_mode = #tpu.pipeline_mode<synchronous>, transform_indices = @transform_5, window_bounds = array<i64: 32, 32>}, {pipeline_mode = #tpu.pipeline_mode<synchronous>, transform_indices = @transform_6, window_bounds = array<i64: 1, 32>}, {pipeline_mode = #tpu.pipeline_mode<synchronous>, transform_indices = @transform_7, window_bounds = array<i64: 32, 128>}, {pipeline_mode = #tpu.pipeline_mode<synchronous>, transform_indices = @transform_8, window_bounds = array<i64: 1, 128>}, {transform_indices = @transform_9, window_bounds = array<i64: 8, 128>}]} {
    %c0 = arith.constant 0 : index
    %c0_0 = arith.constant 0 : index
    %0 = vector.load %arg1[%c0, %c0_0] : memref<8x16xbf16, #tpu.memory_space<vmem>>, vector<8x16xbf16>
    %c0_1 = arith.constant 0 : index
    %c0_2 = arith.constant 0 : index
    %1 = vector.load %arg2[%c0_1, %c0_2] : memref<16x32xbf16, #tpu.memory_space<vmem>>, vector<16x32xbf16>
    %cst = arith.constant dense<0.000000e+00> : vector<8x32xf32>
    %2 = tpu.matmul %0, %1, %cst {dimension_numbers = #tpu.dot_dimension_numbers<[1], [0], [0], [1], [0, 0, 1, 1], [], []>} : vector<8x16xbf16>, vector<16x32xbf16>, vector<8x32xf32> -> vector<8x32xf32>
    %c0_3 = arith.constant 0 : index
    %c0_4 = arith.constant 0 : index
    %3 = vector.load %arg3[%c0_3, %c0_4] : memref<1x32xf32, #tpu.memory_space<vmem>>, vector<1x32xf32>
    %4 = vector.broadcast %3 : vector<1x32xf32> to vector<8x32xf32>
    %5 = arith.addf %2, %4 : vector<8x32xf32>
    %cst_5 = arith.constant 0.000000e+00 : f32
    %6 = vector.broadcast %cst_5 : f32 to vector<8x32xf32>
    %7 = arith.maximumf %5, %6 : vector<8x32xf32>
    %8 = arith.truncf %7 : vector<8x32xf32> to vector<8x32xbf16>
    %c0_6 = arith.constant 0 : index
    %c0_7 = arith.constant 0 : index
    %9 = vector.load %arg4[%c0_6, %c0_7] : memref<32x32xbf16, #tpu.memory_space<vmem>>, vector<32x32xbf16>
    %cst_8 = arith.constant dense<0.000000e+00> : vector<8x32xf32>
    %10 = tpu.matmul %8, %9, %cst_8 {dimension_numbers = #tpu.dot_dimension_numbers<[1], [0], [0], [1], [0, 0, 1, 1], [], []>} : vector<8x32xbf16>, vector<32x32xbf16>, vector<8x32xf32> -> vector<8x32xf32>
    %c0_9 = arith.constant 0 : index
    %c0_10 = arith.constant 0 : index
    %11 = vector.load %arg5[%c0_9, %c0_10] : memref<1x32xf32, #tpu.memory_space<vmem>>, vector<1x32xf32>
    %12 = vector.broadcast %11 : vector<1x32xf32> to vector<8x32xf32>
    %13 = arith.addf %10, %12 : vector<8x32xf32>
    %cst_11 = arith.constant 0.000000e+00 : f32
    %14 = vector.broadcast %cst_11 : f32 to vector<8x32xf32>
    %15 = arith.maximumf %13, %14 : vector<8x32xf32>
    %16 = arith.truncf %15 : vector<8x32xf32> to vector<8x32xbf16>
    %c0_12 = arith.constant 0 : index
    %c0_13 = arith.constant 0 : index
    %17 = vector.load %arg6[%c0_12, %c0_13] : memref<32x32xbf16, #tpu.memory_space<vmem>>, vector<32x32xbf16>
    %cst_14 = arith.constant dense<0.000000e+00> : vector<8x32xf32>
    %18 = tpu.matmul %16, %17, %cst_14 {dimension_numbers = #tpu.dot_dimension_numbers<[1], [0], [0], [1], [0, 0, 1, 1], [], []>} : vector<8x32xbf16>, vector<32x32xbf16>, vector<8x32xf32> -> vector<8x32xf32>
    %c0_15 = arith.constant 0 : index
    %c0_16 = arith.constant 0 : index
    %19 = vector.load %arg7[%c0_15, %c0_16] : memref<1x32xf32, #tpu.memory_space<vmem>>, vector<1x32xf32>
    %20 = vector.broadcast %19 : vector<1x32xf32> to vector<8x32xf32>
    %21 = arith.addf %18, %20 : vector<8x32xf32>
    %cst_17 = arith.constant 0.000000e+00 : f32
    %22 = vector.broadcast %cst_17 : f32 to vector<8x32xf32>
    %23 = arith.maximumf %21, %22 : vector<8x32xf32>
    %24 = arith.truncf %23 : vector<8x32xf32> to vector<8x32xbf16>
    %c0_18 = arith.constant 0 : index
    %c0_19 = arith.constant 0 : index
    %25 = vector.load %arg8[%c0_18, %c0_19] : memref<32x128xbf16, #tpu.memory_space<vmem>>, vector<32x128xbf16>
    %cst_20 = arith.constant dense<0.000000e+00> : vector<8x128xf32>
    %26 = tpu.matmul %24, %25, %cst_20 {dimension_numbers = #tpu.dot_dimension_numbers<[1], [0], [0], [1], [0, 0, 1, 1], [], []>} : vector<8x32xbf16>, vector<32x128xbf16>, vector<8x128xf32> -> vector<8x128xf32>
    %c0_21 = arith.constant 0 : index
    %c0_22 = arith.constant 0 : index
    %27 = vector.load %arg9[%c0_21, %c0_22] : memref<1x128xf32, #tpu.memory_space<vmem>>, vector<1x128xf32>
    %28 = vector.broadcast %27 : vector<1x128xf32> to vector<8x128xf32>
    %29 = arith.addf %26, %28 : vector<8x128xf32>
    %c0_23 = arith.constant 0 : index
    %c0_24 = arith.constant 0 : index
    %30 = vector.load %arg10[%c0_23, %c0_24] : memref<8x128xf32, #tpu.memory_space<vmem>>, vector<8x128xf32>
    tpu.vector_store %arg10[%c0_23, %c0_24], %29 {strides = array<i32>} : memref<8x128xf32, #tpu.memory_space<vmem>>, vector<8x128xf32>,
    return
  }
  func.func @transform_0(%arg0: i32) -> (i32, i32) {
    %c0_i32 = arith.constant 0 : i32
    %c0_i32_0 = arith.constant 0 : i32
    return %arg0, %c0_i32 : i32, i32
  }
  func.func @transform_1(%arg0: i32) -> (i32, i32) {
    %c0_i32 = arith.constant 0 : i32
    %c0_i32_0 = arith.constant 0 : i32
    %c0_i32_1 = arith.constant 0 : i32
    return %c0_i32, %c0_i32_0 : i32, i32
  }
  func.func @transform_2(%arg0: i32) -> (i32, i32) {
    %c0_i32 = arith.constant 0 : i32
    %c0_i32_0 = arith.constant 0 : i32
    %c0_i32_1 = arith.constant 0 : i32
    return %c0_i32, %c0_i32_0 : i32, i32
  }
  func.func @transform_3(%arg0: i32) -> (i32, i32) {
    %c0_i32 = arith.constant 0 : i32
    %c0_i32_0 = arith.constant 0 : i32
    %c0_i32_1 = arith.constant 0 : i32
    return %c0_i32, %c0_i32_0 : i32, i32
  }
  func.func @transform_4(%arg0: i32) -> (i32, i32) {
    %c0_i32 = arith.constant 0 : i32
    %c0_i32_0 = arith.constant 0 : i32
    %c0_i32_1 = arith.constant 0 : i32
    return %c0_i32, %c0_i32_0 : i32, i32
  }
  func.func @transform_5(%arg0: i32) -> (i32, i32) {
    %c0_i32 = arith.constant 0 : i32
    %c0_i32_0 = arith.constant 0 : i32
    %c0_i32_1 = arith.constant 0 : i32
    return %c0_i32, %c0_i32_0 : i32, i32
  }
  func.func @transform_6(%arg0: i32) -> (i32, i32) {
    %c0_i32 = arith.constant 0 : i32
    %c0_i32_0 = arith.constant 0 : i32
    %c0_i32_1 = arith.constant 0 : i32
    return %c0_i32, %c0_i32_0 : i32, i32
  }
  func.func @transform_7(%arg0: i32) -> (i32, i32) {
    %c0_i32 = arith.constant 0 : i32
    %c0_i32_0 = arith.constant 0 : i32
    %c0_i32_1 = arith.constant 0 : i32
    return %c0_i32, %c0_i32_0 : i32, i32
  }
  func.func @transform_8(%arg0: i32) -> (i32, i32) {
    %c0_i32 = arith.constant 0 : i32
    %c0_i32_0 = arith.constant 0 : i32
    %c0_i32_1 = arith.constant 0 : i32
    return %c0_i32, %c0_i32_0 : i32, i32
  }
  func.func @transform_9(%arg0: i32) -> (i32, i32) {
    %c0_i32 = arith.constant 0 : i32
    %c0_i32_0 = arith.constant 0 : i32
    return %arg0, %c0_i32 : i32, i32
  }
}

</mosaic_0001>

<bundles_post_ra>
// kernel: tpu_custom_call.1
= control target key start
LH: loop header
LB: loop body
LE: loop exit
PB: predicated region body
PF: predicated region fallthrough
CT: control target
= control target key end

     0   :  { %14 = vsyncpa [#allocation3], 0  ;;  %s569_s0 = inlined_call_operand.hbm [shape: bf16[8,16], index: 0, kind: input, shape index: {}]   ;;  %s570_s1 = inlined_call_operand.hbm [shape: bf16[16,32], index: 1, kind: input, shape index: {}]   ;;  %s571_s2 = inlined_call_operand.vmem [shape: f32[1,32], index: 2, kind: input, shape index: {}]   ;;  %s572_s3 = inlined_call_operand.hbm [shape: bf16[32,32], index: 3, kind: input, shape index: {}]   ;;  %s573_s4 = inlined_call_operand.vmem [shape: f32[1,32], index: 4, kind: input, shape index: {}]   ;;  %s574_s5 = inlined_call_operand.hbm [shape: bf16[32,32], index: 5, kind: input, shape index: {}]   ;;  %s575_s6 = inlined_call_operand.vmem [shape: f32[1,32], index: 6, kind: input, shape index: {}]   ;;  %s576_s7 = inlined_call_operand.hbm [shape: bf16[32,128], index: 7, kind: input, shape index: {}]   ;;  %s577_s8 = inlined_call_operand.vmem [shape: f32[1,128], index: 8, kind: input, shape index: {}]   ;;  %s578_s9 = inlined_call_operand.hbm [shape: f32[8,128], index: 9, kind: output, shape index: {}]  }
   0x1   :  { %15 = vsyncpa [#allocation6], 0 }
   0x2   :  { %16 = vsyncpa [#allocation9], 0  ;;  %s33_s11 = sshll.u32 %s570_s1, 4  ;;  %s34_s11 = int_to_ptr.hbm [resolvable:$true] %s33_s11 }
   0x3   :  { %17 = vsyncpa [#allocation4], 0  ;;  %s478_s12 = smov [#allocation5]   ;;  %s63_s16 = sshll.u32 %s574_s5, 4  ;;  %s64_s16 = int_to_ptr.hbm [resolvable:$true] %s63_s16 }
   0x4   :  { %s35_s13 = sshll.u32 %s478_s12, 4  ;;  %s479_s17 = smov 64   ;;  %s36_s13 = int_to_ptr.vmem [resolvable:$true] %s35_s13 }
   0x5   :  { %s480_s18 = smov 4   ;;  %s481_s19 = smov [#allocation8]  }
   0x6   :  { %41 = dma.hbm_to_vmem [thread:$0]  %s34_s11, 128, %s36_s13, [#allocation6], %s479_s17, %s479_s17, %s480_s18  }
   0x7   :  { %s65_s20 = sshll.u32 %s481_s19, 4  ;;  %s23_s23 = sshll.u32 %s569_s0, 4  ;;  %s66_s20 = int_to_ptr.vmem [resolvable:$true] %s65_s20  ;;  %s24_s23 = int_to_ptr.hbm [resolvable:$true] %s23_s23 }
   0x8   :  { %71 = dma.hbm_to_vmem [thread:$0]  %s64_s16, 256, %s66_s20, [#allocation9], %s479_s17, %s479_s17, %s480_s18  }
   0x9   :  { %s48_s25 = sshll.u32 %s572_s3, 4  ;;  %s482_s26 = smov [#allocation2]   ;;  %s49_s25 = int_to_ptr.hbm [resolvable:$true] %s48_s25 }
   0xa   :  { %s25_s27 = sshll.u32 %s482_s26, 4  ;;  %s483_s5 = smov [#allocation7]   ;;  %s26_s27 = int_to_ptr.vmem [resolvable:$true] %s25_s27 }
   0xb   :  { %28 = dma.hbm_to_vmem [thread:$0]  %s24_s23, 64, %s26_s27, [#allocation3]  }
   0xc   :  { %s50_s28 = sshll.u32 %s483_s5, 4  ;;  %s78_s10 = sshll.u32 %s576_s7, 4  ;;  %s51_s28 = int_to_ptr.vmem [resolvable:$true] %s50_s28  ;;  %s79_s10 = int_to_ptr.hbm [resolvable:$true] %s78_s10 }
   0xd   :  { %56 = dma.hbm_to_vmem [thread:$0]  %s49_s25, 256, %s51_s28, [#allocation6], %s479_s17, %s479_s17, %s480_s18  }
   0xe   :  { %s484_s0 = smov [#allocation10]  }
   0xf   :  { %s80_s11 = sshll.u32 %s484_s0, 4  ;;  %s81_s11 = int_to_ptr.vmem [resolvable:$true] %s80_s11 }
  0x10   :  { %86 = dma.hbm_to_vmem [thread:$0]  %s79_s10, 256, %s81_s11, [#allocation9], %s479_s17, %s479_s17, %s480_s18  }
  0x11   :  { %470 = dma.done.wait [#allocation3], 64  }
  0x12   :  { %471 = vsyncadd [#allocation3], 4294967232 }
  0x13   :  { %472 = dma.done.wait [#allocation6], 384  }
  0x14   :  { %473 = vsyncadd [#allocation6], 4294966912 }
  0x15   :  { %474 = dma.done.wait [#allocation9], 512  }
  0x16   :  { %475 = vsyncadd [#allocation9], 4294966784  ;;  %v307_v0 = vld [vmem:[#allocation5] sm:$0xff]  ;;  %v110_v1 = vld [vmem:[#allocation2] sm:$0xf]  ;;  %vm123_vm0 = vcmask 130048  }
  0x17   :  { %134 = vmatpush.bf16.msra.mxu0 %v307_v0  ;;  %v309_v2 = vld [vmem:[#allocation7 + $0x8] sm:$0xff]  ;;  %v308_v3 = vld [vmem:[#allocation7] sm:$0xff]  ;;  %v322_v4 = vld [vmem:[%s571_s2] ss:$0 sm:$0xff]  ;;  %vm162_vm1 = vcmask 261120   ;;  %s485_s16 = smov [#allocation11]  }
  0x18   :  { %172 = vmatpush.bf16.msra.mxu1 %v309_v2  ;;  %v311_v10 = vld [vmem:[#allocation8 + $0x8] sm:$0xff]  ;;  %v310_v11 = vld [vmem:[#allocation8] sm:$0xff]  ;;  %v313_v18 = vld [vmem:[#allocation10 + $0x8] sm:$0xff]  ;;  %s261_s17 = sshll.u32 %s485_s16, 4  ;;  %s263_s20 = sshll.u32 %s578_s9, 4  ;;  %s262_s17 = int_to_ptr.vmem [resolvable:$true] %s261_s17  ;;  %s264_s20 = int_to_ptr.hbm [resolvable:$true] %s263_s20 }
  0x19   :  { %210 = vmatpush.bf16.msra.mxu2 %v311_v10  ;;  %v323_v12 = vld [vmem:[%s573_s4] ss:$0 sm:$0xff]  ;;  %248 = vmatpush.bf16.msra.mxu3 %v313_v18  ;;  %v312_v19 = vld [vmem:[#allocation10] sm:$0xff] }
  0x1a   :  { %279 = vmatmul.msk.bf16.vlgmr.msra.gmra.mxu0 %vm123_vm0, %v110_v1  ;;  %v324_v20 = vld [vmem:[%s575_s6] ss:$0 sm:$0xff] }
  0x1b   :  { %v325_v26 = vld [vmem:[%s577_s8] ss:$0 sm:$0xff] }
  0x1c   :  { %173 = vmatpush.bf16.msra.mxu1 %v308_v3 }
  0x1d   :  { %211 = vmatpush.bf16.msra.mxu2 %v310_v11  ;;  %249 = vmatpush.bf16.msra.mxu3 %v312_v19 }
  0x97   :  { %v136_v5 = vpop.f32.mrf.mxu0 }
  0x98   :  { %v137_v6 = vadd.f32 %v322_v4, %v136_v5 }
  0x9a   :  { %v140_v7 = vmax.f32 %v137_v6, 0.0 }
  0x9c   :  { %v141_v8 = vpack.c.bf16 %v140_v7, %v140_v7 }
  0x9e   :  { %288 = vmatmul.msk.bf16.vlgmr.msra.gmra.mxu1 %vm162_vm1, %v141_v8 }
  0x9f   :  { %v138_v9 = vpop.f32.mrf.mxu0 }
 0x11b   :  { %v175_v13 = vpop.f32.mrf.mxu1 }
 0x11c   :  { %v176_v14 = vadd.f32 %v323_v12, %v175_v13 }
 0x11e   :  { %v179_v15 = vmax.f32 %v176_v14, 0.0 }
 0x120   :  { %v180_v16 = vpack.c.bf16 %v179_v15, %v179_v15 }
 0x122   :  { %297 = vmatmul.msk.bf16.vlgmr.msra.gmra.mxu2 %vm162_vm1, %v180_v16 }
 0x123   :  { %v177_v17 = vpop.f32.mrf.mxu1 }
 0x1a5   :  { %v213_v21 = vpop.f32.mrf.mxu2 }
 0x1a6   :  { %v214_v22 = vadd.f32 %v324_v20, %v213_v21 }
 0x1a8   :  { %v217_v23 = vmax.f32 %v214_v22, 0.0 }
 0x1aa   :  { %v218_v24 = vpack.c.bf16 %v217_v23, %v217_v23 }
 0x1ac   :  { %306 = vmatmul.msk.bf16.vlgmr.msra.gmra.mxu3 %vm162_vm1, %v218_v24 }
 0x1ad   :  { %v215_v25 = vpop.f32.mrf.mxu2 }
 0x22f   :  { %v251_v27 = vpop.f32.mrf.mxu3 }
 0x230   :  { %v252_v28 = vadd.f32 %v325_v26, %v251_v27 }
 0x232   :  { %255 = vst [vmem:[#allocation11] sm:$0xff] %v252_v28 }
 0x233   :  { %266 = dma.vmem_to_hbm [thread:$0]  %s262_s17, 128, %s264_s20, [#allocation4]  }
 0x237   :  { %v253_v29 = vpop.f32.mrf.mxu3 }
 0x238   :  { %476 = dma.done.wait [#allocation4], 128  }
 0x239   :  { %477 = vsyncadd [#allocation4], 4294967168 }
 0x23a   :  { %271 = vsyncpa [#allocation3], 1 }
 0x23b   :  { %272 = vsyncpa [#allocation6], 1 }
 0x23c   :  { %273 = vsyncpa [#allocation9], 1 }
 0x23d   :  { %274 = vsyncpa [#allocation4], 1 }

</bundles_post_ra>
